<compile_context>
chip_gen: v5e
topology: v5e:2x2
jax: 0.10.0
libtpu: 0.0.40
codegen_flags: <defaults>
</compile_context>

<pallas_src>
import jax
import jax.numpy as jnp
from jax.experimental import pallas as pl
from jax.experimental.pallas import tpu as pltpu


def _drop_path_kernel(scale_ref, x_ref, o_ref):
    # scale_ref: (rows, 1) f32 block -- per-row (aligned path) or per-sample
    #            (ragged path) keep scale.
    # x_ref / o_ref: (rows, cols) tile of the input / output.
    s = scale_ref[...].astype(x_ref.dtype)        # multiply in the input dtype
    o_ref[...] = x_ref[...] * s                   # lane-broadcast multiply


def drop_path_pallas(x, drop_prob: float, training: bool, key, *,
                     block_bytes: int = 2 * 1024 * 1024,
                     min_pallas_bytes: int = 0,
                     donate_x: bool = False):
    """DropPath forward. x: (B, ...). Returns same shape/dtype."""
    if drop_prob == 0.0 or not training:
        return x

    keep_prob = 1.0 - float(drop_prob)
    B = x.shape[0]
    F = 1
    for d in x.shape[1:]:
        F *= d

    # Per-sample Bernoulli keep mask / scale (tiny (B,) op, f32).
    rand = jax.random.uniform(key, (B,), dtype=jnp.float32)
    scale = jnp.floor(keep_prob + rand) * (1.0 / keep_prob)          # (B,) f32

    itemsize = jnp.dtype(x.dtype).itemsize
    total_bytes = B * F * itemsize

    # Tiny tensors: a standalone kernel's launch/grid overhead dwarfs the copy;
    # let XLA fuse the broadcast multiply instead (enable via min_pallas_bytes).
    if total_bytes < min_pallas_bytes:
        return x * scale.astype(x.dtype).reshape((B,) + (1,) * (x.ndim - 1))

    io_alias = {1: 0} if donate_x else {}         # input 1 is the tensor x
    cparams = pltpu.CompilerParams(dimension_semantics=("parallel",))

    if F % 128 == 0:
        # ---- aligned path: flat (B*rows, 128) lane-dense slab, 1-D row grid.
        rows = F // 128
        total_rows = B * rows
        tr = max(8, (block_bytes // (128 * itemsize)) // 8 * 8)
        tile_rows = total_rows if total_rows <= tr else tr
        grid = (pl.cdiv(total_rows, tile_rows),)

        x_flat = x.reshape(total_rows, 128)                   # copy-free view
        scale_rows = jnp.broadcast_to(scale[:, None], (B, rows)).reshape(
            total_rows, 1)                                    # tiny (B*rows,1)

        out_flat = pl.pallas_call(
            _drop_path_kernel,
            out_shape=jax.ShapeDtypeStruct((total_rows, 128), x.dtype),
            grid=grid,
            in_specs=[
                pl.BlockSpec((tile_rows, 1), lambda i: (i, 0)),
                pl.BlockSpec((tile_rows, 128), lambda i: (i, 0)),
            ],
            out_specs=pl.BlockSpec((tile_rows, 128), lambda i: (i, 0)),
            compiler_params=cparams,
            input_output_aliases=io_alias,
        )(scale_rows, x_flat)
        return out_flat.reshape(x.shape)

    # ---- ragged path: keep 2-D (B, F); tile the last dim, partial edge block
    # is masked by Pallas (no padding, no post-slice).
    eff_rows = ((B + 7) // 8) * 8      # conservative VMEM estimate (sublane pad)
    tf = max(128, (block_bytes // (eff_rows * itemsize)) // 128 * 128)
    tile_f = F if F <= tf else tf
    grid = (pl.cdiv(F, tile_f),)

    x2d = x.reshape(B, F)                                     # copy-free view
    scale2d = scale.reshape(B, 1)

    out2d = pl.pallas_call(
        _drop_path_kernel,
        out_shape=jax.ShapeDtypeStruct((B, F), x.dtype),
        grid=grid,
        in_specs=[
            pl.BlockSpec((B, 1), lambda i: (0, 0)),
            pl.BlockSpec((B, tile_f), lambda i: (0, i)),
        ],
        out_specs=pl.BlockSpec((B, tile_f), lambda i: (0, i)),
        compiler_params=cparams,
        input_output_aliases=io_alias,
    )(scale2d, x2d)
    return out2d.reshape(x.shape)


if __name__ == "__main__":
    key = jax.random.PRNGKey(0)
    kx, kr, kx2, kx3, kx4 = jax.random.split(key, 5)

    drop_prob = 0.3
    keep_prob = 1.0 - drop_prob

    def reference(x, key):
        B = x.shape[0]
        rand = jax.random.uniform(key, (B,), dtype=jnp.float32)
        scale = jnp.floor(keep_prob + rand) * (1.0 / keep_prob)
        return x * scale.astype(x.dtype).reshape((B,) + (1,) * (x.ndim - 1))

    # --- main shape: (B, C, H, W) = (2, 4, 16, 16), F = 1024 (aligned path)
    B, C, H, W = 2, 4, 16, 16
    x = jax.random.normal(kx, (B, C, H, W), dtype=jnp.float32)
    out = jax.block_until_ready(drop_path_pallas(x, drop_prob, True, kr))
    assert jnp.allclose(out, reference(x, kr), atol=1e-6, rtol=1e-6)

    # --- ragged F (= 3*5*7 = 105): 2-D (B, F) path, single full-width block
    x_r = jax.random.normal(kx2, (2, 3, 5, 7), dtype=jnp.float32)
    out_r = jax.block_until_ready(drop_path_pallas(x_r, drop_prob, True, kr))
    assert jnp.allclose(out_r, reference(x_r, kr), atol=1e-6, rtol=1e-6)

    # --- ragged F (= 255) with a tiny block override: multi-step grid with a
    #     masked partial edge block on the ragged path
    x_r2 = jax.random.normal(kx3, (2, 3, 5, 17), dtype=jnp.float32)
    out_r2 = jax.block_until_ready(
        drop_path_pallas(x_r2, drop_prob, True, kr, block_bytes=1024))
    assert jnp.allclose(out_r2, reference(x_r2, kr), atol=1e-6, rtol=1e-6)

    # --- bf16 aligned shape with small blocks: multi-step 1-D row grid with a
    #     partial last block (total_rows=192, tile_rows=128)
    x_m = jax.random.normal(kx4, (3, 8, 32, 32), dtype=jnp.bfloat16)
    out_m = jax.block_until_ready(
        drop_path_pallas(x_m, drop_prob, True, kr, block_bytes=32 * 1024))
    assert jnp.allclose(out_m.astype(jnp.float32),
                        reference(x_m, kr).astype(jnp.float32),
                        atol=1e-2, rtol=1e-2)

    # --- tiny-tensor XLA fast path gives the same numerics
    out_f = jax.block_until_ready(
        drop_path_pallas(x, drop_prob, True, kr, min_pallas_bytes=1 << 20))
    assert jnp.allclose(out_f, reference(x, kr), atol=1e-6, rtol=1e-6)

    # --- eval-mode forward is identity
    assert jnp.array_equal(drop_path_pallas(x, drop_prob, False, kr), x)

    print("KERNEL_OK")
</pallas_src>

<mosaic_0001>
module attributes {stable_mosaic.version = 11 : i64} {
  func.func @_drop_path_kernel(%arg0: i32, %arg1: memref<16x1xf32, #tpu.memory_space<vmem>>, %arg2: memref<16x128xf32, #tpu.memory_space<vmem>>, %arg3: memref<16x128xf32, #tpu.memory_space<vmem>>) attributes {dimension_semantics = [#tpu.dimension_semantics<parallel>], iteration_bounds = array<i64: 1>, scalar_prefetch = 0 : i64, scratch_operands = 0 : i64, tpu.core_type = #tpu.core_type<tc>, window_params = [{transform_indices = @transform_0, window_bounds = array<i64: 16, 1>}, {transform_indices = @transform_1, window_bounds = array<i64: 16, 128>}, {transform_indices = @transform_2, window_bounds = array<i64: 16, 128>}]} {
    %c0 = arith.constant 0 : index
    %c0_0 = arith.constant 0 : index
    %0 = vector.load %arg1[%c0, %c0_0] : memref<16x1xf32, #tpu.memory_space<vmem>>, vector<16x1xf32>
    %c0_1 = arith.constant 0 : index
    %c0_2 = arith.constant 0 : index
    %1 = vector.load %arg2[%c0_1, %c0_2] : memref<16x128xf32, #tpu.memory_space<vmem>>, vector<16x128xf32>
    %2 = vector.broadcast %0 : vector<16x1xf32> to vector<16x128xf32>
    %3 = arith.mulf %1, %2 : vector<16x128xf32>
    %c0_3 = arith.constant 0 : index
    %c0_4 = arith.constant 0 : index
    %4 = vector.load %arg3[%c0_3, %c0_4] : memref<16x128xf32, #tpu.memory_space<vmem>>, vector<16x128xf32>
    tpu.vector_store %arg3[%c0_3, %c0_4], %3 {strides = array<i32>} : memref<16x128xf32, #tpu.memory_space<vmem>>, vector<16x128xf32>,
    return
  }
  func.func @transform_0(%arg0: i32) -> (i32, i32) {
    %c0_i32 = arith.constant 0 : i32
    %c0_i32_0 = arith.constant 0 : i32
    return %arg0, %c0_i32 : i32, i32
  }
  func.func @transform_1(%arg0: i32) -> (i32, i32) {
    %c0_i32 = arith.constant 0 : i32
    %c0_i32_0 = arith.constant 0 : i32
    return %arg0, %c0_i32 : i32, i32
  }
  func.func @transform_2(%arg0: i32) -> (i32, i32) {
    %c0_i32 = arith.constant 0 : i32
    %c0_i32_0 = arith.constant 0 : i32
    return %arg0, %c0_i32 : i32, i32
  }
}

</mosaic_0001>

<bundles_post_ra>
// kernel: tpu_custom_call.1
= control target key start
LH: loop header
LB: loop body
LE: loop exit
PB: predicated region body
PF: predicated region fallthrough
CT: control target
= control target key end

     0   :  { %v79_v1 = vmov 0   ;;  %s113_s0 = inlined_call_operand.vmem [shape: f32[16,1], index: 0, kind: input, shape index: {}]   ;;  %s114_s1 = inlined_call_operand.vmem [shape: f32[16,128], index: 1, kind: input, shape index: {}]   ;;  %s115_s2 = inlined_call_operand.hbm [shape: f32[16,128], index: 2, kind: output, shape index: {}]  }
   0x1   :  { %v12_v0 = vld [vmem:[%s113_s0] sm:$0xff]  ;;  %52 = vset.pattern.permute.xlu0 %v79_v1 }
   0x2   :  { %7 = vsyncpa [#allocation3], 0  ;;  %18 = vperm.xlu0 %52, %v12_v0   ;;  %v13_v2 = vld [vmem:[%s113_s0 + $0x8] sm:$0xff]  ;;  %v14_v3 = vld [vmem:[%s114_s1] sm:$0xff]  ;;  %s80_s15 = smov [#allocation2]   ;;  %s36_s19 = sshll.u32 %s115_s2, 4  ;;  %s37_s19 = int_to_ptr.hbm [resolvable:$true] %s36_s19 }
   0x3   :  { %s34_s16 = sshll.u32 %s80_s15, 4  ;;  %v15_v6 = vld [vmem:[%s114_s1 + $0x8] sm:$0xff]  ;;  %s81_s0 = smov 128   ;;  %s35_s16 = int_to_ptr.vmem [resolvable:$true] %s34_s16 }
   0x4   :  { %s82_s22 = smov 8  }
   0xa   :  { %23 = vperm.xlu0 %52, %v13_v2  }
  0x74   :  { %v19_v4 = vpop.permute.xlu0 %18 }
  0x75   :  { %v26_v5 = vmul.f32 %v19_v4, %v14_v3 }
  0x77   :  { %28 = vst [vmem:[#allocation2] sm:$0xff] %v26_v5 }
  0x7c   :  { %v24_v7 = vpop.permute.xlu0 %23 }
  0x7d   :  { %v27_v8 = vmul.f32 %v24_v7, %v15_v6 }
  0x7f   :  { %29 = vst [vmem:[#allocation2 + $0x8] sm:$0xff] %v27_v8 }
  0x80   :  { %42 = dma.vmem_to_hbm [thread:$0]  %s35_s16, 256, %s37_s19, [#allocation3], %s81_s0, %s81_s0, %s82_s22  }
  0x81   :  { %77 = dma.done.wait [#allocation3], 256  }
  0x82   :  { %78 = vsyncadd [#allocation3], 4294967040 }
  0x83   :  { %47 = vsyncpa [#allocation3], 1 }

</bundles_post_ra>
